<compile_context>
chip_gen: v6e
topology: v6e:2x2x1
jax: 0.10.0
libtpu: 0.0.40
codegen_flags: <defaults>
</compile_context>

<pallas_src>
import functools

import jax
import jax.numpy as jnp
from jax import lax
from jax.experimental import pallas as pl
from jax.experimental.pallas import tpu as pltpu


def _attention_kernel(q_ref, k_ref, v_ref, o_ref, *, use_bf16_operands):
    # q_ref: (1, q_block, W)   k_ref, v_ref: (1, CH, W)   o_ref: (1, q_block, W)
    q = q_ref[0]                      # (q_block, W)
    k = k_ref[0]                      # (CH, W)
    v = v_ref[0]                      # (CH, W)

    if use_bf16_operands:             # full-rate MXU path on v6e / v7x
        q = q.astype(jnp.bfloat16)
        k = k.astype(jnp.bfloat16)
        v = v.astype(jnp.bfloat16)

    # scores = Q @ K^T over the W (feature) axis -> (q_block, CH), f32 accum.
    s = lax.dot_general(q, k, (((1,), (1,)), ((), ())),
                        preferred_element_type=jnp.float32)

    # Softmax along the last axis (F.softmax(..., dim=-1)), normalization
    # deferred past the P @ V matmul.
    m = jnp.max(s, axis=-1, keepdims=True)                # (q_block, 1)
    p = jnp.exp(s - m)                                     # (q_block, CH), f32
    row_sum = jnp.sum(p, axis=-1, keepdims=True)           # (q_block, 1)

    # Unnormalized P @ V -> (q_block, W), f32 accumulation on the MXU.
    u = jnp.dot(p.astype(v.dtype), v, preferred_element_type=jnp.float32)

    # Fused normalization: EUP reciprocal + small multiply instead of a divide.
    o = u * pl.reciprocal(row_sum, approx=True)
    o_ref[0] = o.astype(o_ref.dtype)


def cross_attention(v1, v2, params, *, q_block=None, use_bf16_operands=False):
    """Forward pass of CrossAttention.  v1, v2: (B, C, H, W) float32."""
    B, C, H, W = v1.shape
    CH = C * H
    HW = H * W

    wq, bq = params["query_v1"]
    wk, bk = params["key_v2"]
    wv, bv = params["value_v2"]

    # 1x1-conv projections: a C x C channel mix on the lane-dense (C, H*W)
    # view.  Tiny (C=4); XLA handles it -- no kron expansion, no weight/bias
    # traffic into the kernel.
    x1 = v1.reshape(B, C, HW)
    x2 = v2.reshape(B, C, HW)
    q = jnp.einsum("oc,bcp->bop", wq, x1) + bq[None, :, None]
    k = jnp.einsum("oc,bcp->bop", wk, x2) + bk[None, :, None]
    v = jnp.einsum("oc,bcp->bop", wv, x2) + bv[None, :, None]

    # Free (contiguous-dims) reshape to the attention view used by forward():
    # .view(B, C*H, W)
    qf = q.reshape(B, CH, W)
    kf = k.reshape(B, CH, W)
    vf = v.reshape(B, CH, W)

    if q_block is None:
        q_block = CH
    assert CH % q_block == 0, "q_block must divide C*H"
    assert q_block % 8 == 0 or q_block == CH, "q_block must keep (8,128) tiling"
    nq = CH // q_block

    kernel = functools.partial(_attention_kernel,
                               use_bf16_operands=use_bf16_operands)

    out = pl.pallas_call(
        kernel,
        out_shape=jax.ShapeDtypeStruct((B, CH, W), jnp.float32),
        grid_spec=pltpu.PrefetchScalarGridSpec(
            num_scalar_prefetch=0,
            grid=(B, nq),
            in_specs=[
                pl.BlockSpec((1, q_block, W), lambda b, i: (b, i, 0)),  # Q
                pl.BlockSpec((1, CH, W), lambda b, i: (b, 0, 0)),       # K
                pl.BlockSpec((1, CH, W), lambda b, i: (b, 0, 0)),       # V
            ],
            out_specs=pl.BlockSpec((1, q_block, W), lambda b, i: (b, i, 0)),
        ),
        compiler_params=pltpu.CompilerParams(
            dimension_semantics=("parallel", "parallel"),
            # Tiny footprint (~16 KB of blocks per step plus the (q_block, CH)
            # score tile); made explicit so the budget stays visible when CH
            # scales, especially on v7x's 64 MiB VMEM.
            vmem_limit_bytes=32 * 1024 * 1024,
        ),
    )(qf, kf, vf)

    return out.reshape(B, C, H, W)


def cross_attention_reference(v1, v2, params):
    """Pure-JAX reference matching the PyTorch forward exactly."""
    def conv1x1(x, w, b):
        return jnp.einsum("oc,bchw->bohw", w, x) + b[None, :, None, None]

    q = conv1x1(v1, *params["query_v1"])
    k = conv1x1(v2, *params["key_v2"])
    v = conv1x1(v2, *params["value_v2"])
    B, C, H, W = v1.shape
    qf = q.reshape(B, C * H, W)
    kf = k.reshape(B, C * H, W)
    vf = v.reshape(B, C * H, W)
    s = jnp.einsum("biw,bjw->bij", qf, kf)
    a = jax.nn.softmax(s, axis=-1)
    o = jnp.einsum("bij,bjw->biw", a, vf)
    return o.reshape(B, C, H, W)


if __name__ == "__main__":
    B, C, H, W = 2, 4, 16, 16
    key = jax.random.PRNGKey(0)
    ks = jax.random.split(key, 8)

    # Deterministic synthetic parameters (Conv2d kernel_size=1 -> weight (C, C), bias (C,))
    params = {
        "query_v1": (0.2 * jax.random.normal(ks[0], (C, C), jnp.float32),
                     0.1 * jax.random.normal(ks[1], (C,), jnp.float32)),
        "key_v2":   (0.2 * jax.random.normal(ks[2], (C, C), jnp.float32),
                     0.1 * jax.random.normal(ks[3], (C,), jnp.float32)),
        "value_v2": (0.2 * jax.random.normal(ks[4], (C, C), jnp.float32),
                     0.1 * jax.random.normal(ks[5], (C,), jnp.float32)),
    }

    v1 = jax.random.normal(ks[6], (B, C, H, W), jnp.float32)
    v2 = jax.random.normal(ks[7], (B, C, H, W), jnp.float32)

    ref = cross_attention_reference(v1, v2, params)

    # Default configuration: one query block per batch element (grid = (B, 1)).
    out = cross_attention(v1, v2, params)
    jax.block_until_ready(out)
    assert out.shape == (B, C, H, W)
    # Tolerance covers the approximate EUP reciprocal used for the fused
    # softmax normalization; real layout/math bugs are orders of magnitude larger.
    assert jnp.allclose(out, ref, atol=2e-3, rtol=2e-3), "mismatch vs reference"

    # Query-axis split (what you would use with B == 1 on v7x to feed both
    # TensorCores): grid = (B, 2).
    out_split = cross_attention(v1, v2, params, q_block=(C * H) // 2)
    jax.block_until_ready(out_split)
    assert jnp.allclose(out_split, ref, atol=2e-3, rtol=2e-3), "mismatch vs reference (q-split)"

    print("KERNEL_OK")
</pallas_src>

<mosaic_0001>
module attributes {stable_mosaic.version = 11 : i64} {
  func.func @_attention_kernel(%arg0: i32, %arg1: i32, %arg2: memref<1x64x16xf32, #tpu.memory_space<vmem>>, %arg3: memref<1x64x16xf32, #tpu.memory_space<vmem>>, %arg4: memref<1x64x16xf32, #tpu.memory_space<vmem>>, %arg5: memref<1x64x16xf32, #tpu.memory_space<vmem>>) attributes {dimension_semantics = [#tpu.dimension_semantics<parallel>, #tpu.dimension_semantics<parallel>], iteration_bounds = array<i64: 2, 1>, scalar_prefetch = 0 : i64, scratch_operands = 0 : i64, tpu.core_type = #tpu.core_type<tc>, window_params = [{transform_indices = @transform_0, window_bounds = array<i64: 1, 64, 16>}, {transform_indices = @transform_1, window_bounds = array<i64: 1, 64, 16>}, {transform_indices = @transform_2, window_bounds = array<i64: 1, 64, 16>}, {transform_indices = @transform_3, window_bounds = array<i64: 1, 64, 16>}]} {
    %c0 = arith.constant 0 : index
    %c0_0 = arith.constant 0 : index
    %c0_1 = arith.constant 0 : index
    %0 = vector.load %arg2[%c0, %c0_0, %c0_1] : memref<1x64x16xf32, #tpu.memory_space<vmem>>, vector<1x64x16xf32>
    %1 = vector.shape_cast %0 : vector<1x64x16xf32> to vector<64x16xf32>
    %c0_2 = arith.constant 0 : index
    %c0_3 = arith.constant 0 : index
    %c0_4 = arith.constant 0 : index
    %2 = vector.load %arg3[%c0_2, %c0_3, %c0_4] : memref<1x64x16xf32, #tpu.memory_space<vmem>>, vector<1x64x16xf32>
    %3 = vector.shape_cast %2 : vector<1x64x16xf32> to vector<64x16xf32>
    %c0_5 = arith.constant 0 : index
    %c0_6 = arith.constant 0 : index
    %c0_7 = arith.constant 0 : index
    %4 = vector.load %arg4[%c0_5, %c0_6, %c0_7] : memref<1x64x16xf32, #tpu.memory_space<vmem>>, vector<1x64x16xf32>
    %5 = vector.shape_cast %4 : vector<1x64x16xf32> to vector<64x16xf32>
    %cst = arith.constant dense<0.000000e+00> : vector<64x64xf32>
    %6 = tpu.matmul %1, %3, %cst {dimension_numbers = #tpu.dot_dimension_numbers<[1], [1], [0], [0], [0, 0, 1, 0], [], []>} : vector<64x16xf32>, vector<64x16xf32>, vector<64x64xf32> -> vector<64x64xf32>
    %cst_8 = arith.constant dense<0xFF800000> : vector<64xf32>
    %7 = vector.multi_reduction <maximumf>, %6, %cst_8 [1] : vector<64x64xf32> to vector<64xf32>
    %8 = vector.shape_cast %7 : vector<64xf32> to vector<64x1xf32>
    %9 = vector.broadcast %8 : vector<64x1xf32> to vector<64x64xf32>
    %10 = arith.subf %6, %9 : vector<64x64xf32>
    %11 = math.exp %10 : vector<64x64xf32>
    %cst_9 = arith.constant dense<0.000000e+00> : vector<64xf32>
    %12 = vector.multi_reduction <add>, %11, %cst_9 [1] : vector<64x64xf32> to vector<64xf32>
    %13 = vector.shape_cast %12 : vector<64xf32> to vector<64x1xf32>
    %cst_10 = arith.constant dense<0.000000e+00> : vector<64x16xf32>
    %14 = tpu.matmul %11, %5, %cst_10 {dimension_numbers = #tpu.dot_dimension_numbers<[1], [0], [0], [1], [0, 0, 1, 1], [], []>} : vector<64x64xf32>, vector<64x16xf32>, vector<64x16xf32> -> vector<64x16xf32>
    %15 = tpu.reciprocal %13 {approx = true} : vector<64x1xf32> -> vector<64x1xf32>
    %16 = vector.broadcast %15 : vector<64x1xf32> to vector<64x16xf32>
    %17 = arith.mulf %14, %16 : vector<64x16xf32>
    %c0_11 = arith.constant 0 : index
    %c0_12 = arith.constant 0 : index
    %c0_13 = arith.constant 0 : index
    %18 = vector.load %arg5[%c0_11, %c0_12, %c0_13] : memref<1x64x16xf32, #tpu.memory_space<vmem>>, vector<1x64x16xf32>
    %19 = vector.shape_cast %18 : vector<1x64x16xf32> to vector<64x16xf32>
    %20 = vector.shape_cast %17 : vector<64x16xf32> to vector<1x64x16xf32>
    tpu.vector_store %arg5[%c0_11, %c0_12, %c0_13], %20 {strides = array<i32>} : memref<1x64x16xf32, #tpu.memory_space<vmem>>, vector<1x64x16xf32>,
    return
  }
  func.func @transform_0(%arg0: i32, %arg1: i32) -> (i32, i32, i32) {
    %c0_i32 = arith.constant 0 : i32
    %c0_i32_0 = arith.constant 0 : i32
    return %arg0, %arg1, %c0_i32 : i32, i32, i32
  }
  func.func @transform_1(%arg0: i32, %arg1: i32) -> (i32, i32, i32) {
    %c0_i32 = arith.constant 0 : i32
    %c0_i32_0 = arith.constant 0 : i32
    %c0_i32_1 = arith.constant 0 : i32
    return %arg0, %c0_i32, %c0_i32_0 : i32, i32, i32
  }
  func.func @transform_2(%arg0: i32, %arg1: i32) -> (i32, i32, i32) {
    %c0_i32 = arith.constant 0 : i32
    %c0_i32_0 = arith.constant 0 : i32
    %c0_i32_1 = arith.constant 0 : i32
    return %arg0, %c0_i32, %c0_i32_0 : i32, i32, i32
  }
  func.func @transform_3(%arg0: i32, %arg1: i32) -> (i32, i32, i32) {
    %c0_i32 = arith.constant 0 : i32
    %c0_i32_0 = arith.constant 0 : i32
    return %arg0, %arg1, %c0_i32 : i32, i32, i32
  }
}

</mosaic_0001>

<bundles_post_ra>
// kernel: tpu_custom_call.1
= control target key start
LH: loop header
LB: loop body
LE: loop exit
PB: predicated region body
PF: predicated region fallthrough
CT: control target
= control target key end

     0   :  { %s996_s12 = smov 0   ;;  %s998_s13 = smov 0   ;;  %s1125_s0 = inlined_call_operand.vmem [shape: f32[2,64,16], index: 0, kind: input, shape index: {}]   ;;  %s1126_s1 = inlined_call_operand.vmem [shape: f32[2,64,16], index: 1, kind: input, shape index: {}]   ;;  %s1127_s2 = inlined_call_operand.vmem [shape: f32[2,64,16], index: 2, kind: input, shape index: {}]   ;;  %s1128_s3 = inlined_call_operand.vmem [shape: f32[2,64,16], index: 3, kind: output, shape index: {}]  }
   0x1   :  { %s1000_s14 = smov 0  }
   0x2 LB: > { %s25_s15 = sadd.s32 1, %s970_s13  ;;  %p769_p0 = scmp.ge.s32.totalorder %s974_s14, 1  ;;  %s974_s14 = sphi %s1000_s14, %s13_s14   ;;  %s970_s13 = sphi %s998_s13, %s1130_s13   ;;  %s966_s12 = sphi %s996_s12, %s1129_s12  }
   0x3   : > { %p27_p1 = scmp.ge.s32.totalorder %s25_s15, 2  ;;  %p178_p2 = scmp.lt.s32.totalorder %s974_s14, 3 }
   0x5   : > { %s1132_s15 = smov (%p27_p1, %s25_s15), 0  ;;  %p179_p3 = pnand %p769_p0, %p178_p2 }
   0x6   : > { %p221_p4 = scmp.lt.s32.totalorder (!%p179_p3), %s966_s12, 1 }
   0x7   : > { %182 = sbr.rel (%p179_p3) target bundleno = 614 (0x266), region = 32 }
   0xc   : > { %s1134_s12 = smov (!%p221_p4, %s966_s12), 1  ;;  %vm274_vm0 = vcmask 130048   ;;  %vm428_vm1 = vcmask 523264  }
   0xd   : > { %s1014_s16 = sshll.u32 %s1134_s12, 6 }
   0xe   : > { %s234_s19 = scalar_lea.vmem %s1126_s1, %s1014_s16  ;;  %s1024_s22 = scalar_lea.vmem %s1125_s0, %s1014_s16 }
   0xf   : > { %v265_v0 = vld [vmem:[%s234_s19 + $0x38] sm:$0xff]  ;;  %v264_v1 = vld [vmem:[%s234_s19 + $0x30] sm:$0xff]  ;;  %v250_v2 = vld [vmem:[%s1024_s22] sm:$0xff]  ;;  %s239_s25 = scalar_lea.vmem %s1127_s2, %s1014_s16  ;;  %s1098_s28 = scalar_lea.vmem %s1128_s3, %s1014_s16 }
  0x10   : > { %840 = vmatprep.subr.msk.mxu0 %vm274_vm0, %v265_v0  ;;  %856 = vmatprep.mubr.msk.f32.mxu0 %vm274_vm0, %v250_v2  ;;  %v263_v3 = vld [vmem:[%s234_s19 + $0x28] sm:$0xff]  ;;  %v262_v4 = vld [vmem:[%s234_s19 + $0x20] sm:$0xff]  ;;  %v261_v5 = vld [vmem:[%s234_s19 + $0x18] sm:$0xff] }
  0x11   : > { %841 = vmatpush3.xpose.msk.msra.mxu0 %vm274_vm0, %v265_v0  ;;  %v260_v6 = vld [vmem:[%s234_s19 + $0x10] sm:$0xff]  ;;  %v259_v7 = vld [vmem:[%s234_s19 + $0x8] sm:$0xff]  ;;  %v258_v8 = vld [vmem:[%s234_s19] sm:$0xff] }
  0x12   : > { %842 = vmatprep.subr.msk.mxu0 %vm274_vm0, %v264_v1  ;;  %v251_v9 = vld [vmem:[%s1024_s22 + $0x8] sm:$0xff]  ;;  %v252_v10 = vld [vmem:[%s1024_s22 + $0x10] sm:$0xff]  ;;  %v253_v11 = vld [vmem:[%s1024_s22 + $0x18] sm:$0xff] }
  0x13   : > { %v254_v12 = vld [vmem:[%s1024_s22 + $0x20] sm:$0xff]  ;;  %v255_v13 = vld [vmem:[%s1024_s22 + $0x28] sm:$0xff]  ;;  %v256_v14 = vld [vmem:[%s1024_s22 + $0x30] sm:$0xff] }
  0x14   : > { %v257_v15 = vld [vmem:[%s1024_s22 + $0x38] sm:$0xff]  ;;  %v272_v33 = vld [vmem:[%s239_s25 + $0x30] sm:$0xff]  ;;  %v271_v34 = vld [vmem:[%s239_s25 + $0x28] sm:$0xff] }
  0x15   : > { %843 = vmatpush3.xpose.msk.msra.mxu0 %vm274_vm0, %v264_v1  ;;  %v273_v32 = vld [vmem:[%s239_s25 + $0x38] sm:$0xff]  ;;  %v270_v35 = vld [vmem:[%s239_s25 + $0x20] sm:$0xff]  ;;  %v268_v37 = vld [vmem:[%s239_s25 + $0x10] sm:$0xff] }
  0x16   : > { %844 = vmatprep.subr.msk.mxu0 %vm274_vm0, %v263_v3  ;;  %868 = vmatprep.subr.mxu1 %v273_v32  ;;  %v269_v36 = vld [vmem:[%s239_s25 + $0x18] sm:$0xff]  ;;  %v267_v38 = vld [vmem:[%s239_s25 + $0x8] sm:$0xff]  ;;  %v266_v39 = vld [vmem:[%s239_s25] sm:$0xff] }
  0x17   : > { %869 = vmatpush3.msra.mxu1 %v273_v32 }
  0x18   : > { %870 = vmatprep.subr.mxu1 %v272_v33 }
  0x19   : > { %845 = vmatpush3.xpose.msk.msra.mxu0 %vm274_vm0, %v263_v3  ;;  %871 = vmatpush3.msra.mxu1 %v272_v33 }
  0x1a   : > { %846 = vmatprep.subr.msk.mxu0 %vm274_vm0, %v262_v4  ;;  %872 = vmatprep.subr.mxu1 %v271_v34 }
  0x1b   : > { %873 = vmatpush3.msra.mxu1 %v271_v34 }
  0x1c   : > { %874 = vmatprep.subr.mxu1 %v270_v35 }
  0x1d   : > { %847 = vmatpush3.xpose.msk.msra.mxu0 %vm274_vm0, %v262_v4  ;;  %875 = vmatpush3.msra.mxu1 %v270_v35 }
  0x1e   : > { %848 = vmatprep.subr.msk.mxu0 %vm274_vm0, %v261_v5  ;;  %876 = vmatprep.subr.mxu1 %v269_v36 }
  0x1f   : > { %877 = vmatpush3.msra.mxu1 %v269_v36 }
  0x20   : > { %878 = vmatprep.subr.mxu1 %v268_v37 }
  0x21   : > { %849 = vmatpush3.xpose.msk.msra.mxu0 %vm274_vm0, %v261_v5  ;;  %879 = vmatpush3.msra.mxu1 %v268_v37 }
  0x22   : > { %850 = vmatprep.subr.msk.mxu0 %vm274_vm0, %v260_v6  ;;  %880 = vmatprep.subr.mxu1 %v267_v38 }
  0x23   : > { %881 = vmatpush3.msra.mxu1 %v267_v38 }
  0x24   : > { %882 = vmatprep.subr.mxu1 %v266_v39 }
  0x25   : > { %851 = vmatpush3.xpose.msk.msra.mxu0 %vm274_vm0, %v260_v6  ;;  %883 = vmatpush3.msra.mxu1 %v266_v39 }
  0x26   : > { %852 = vmatprep.subr.msk.mxu0 %vm274_vm0, %v259_v7 }
  0x29   : > { %853 = vmatpush3.xpose.msk.msra.mxu0 %vm274_vm0, %v259_v7 }
  0x2a   : > { %854 = vmatprep.subr.msk.mxu0 %vm274_vm0, %v258_v8 }
  0x2d   : > { %855 = vmatpush3.xpose.msk.msra.mxu0 %vm274_vm0, %v258_v8 }
  0x30   : > { %857 = vmatmul.mubr.msk.f32.vlgmr.msra.gmra.mxu0 %vm274_vm0, %v251_v9 }
  0x31   : > { %859 = vmatprep.mubr.msk.f32.mxu0 %vm274_vm0, %v252_v10 }
  0x34   : > { %860 = vmatmul.mubr.msk.f32.gmra.mxu0 %vm274_vm0, %v253_v11 }
  0x35   : > { %862 = vmatprep.mubr.msk.f32.mxu0 %vm274_vm0, %v254_v12 }
  0x38   : > { %863 = vmatmul.mubr.msk.f32.gmra.mxu0 %vm274_vm0, %v255_v13 }
  0x39   : > { %865 = vmatprep.mubr.msk.f32.mxu0 %vm274_vm0, %v256_v14 }
  0x3c   : > { %866 = vmatmul.mubr.msk.f32.gmra.mxu0 %vm274_vm0, %v257_v15 }
  0xf0   : > { %v858_v16 = vpop.f32.mrf.mxu0 }
  0xf1   : > { %v432_v21 = vsel %vm428_vm1, %v858_v16, -inf }
  0xf2   : > { %v389_v17 = vpop.f32.mrf.mxu0 }
  0xf3   : > { %v429_v18 = vsel %vm428_vm1, %v389_v17, -inf }
  0xf4   : > { %430 = vmax.xlane.f32.xlu0 %v429_v18  ;;  %v861_v19 = vpop.f32.mrf.mxu0 }
  0xf5   : > { %v438_v25 = vsel %vm428_vm1, %v861_v19, -inf }
  0xf6   : > { %v399_v20 = vpop.f32.mrf.mxu0 }
  0xf7   : > { %v435_v22 = vsel %vm428_vm1, %v399_v20, -inf }
  0xf8   : > { %433 = vmax.xlane.f32.xlu0 %v432_v21  ;;  %436 = vmax.xlane.f32.xlu1 %v435_v22  ;;  %v1061_v23 = vpop.f32.mrf.mxu0 }
  0xf9   : > { %v444_v29 = vsel %vm428_vm1, %v1061_v23, -inf }
  0xfa   : > { %v409_v24 = vpop.f32.mrf.mxu0 }
  0xfb   : > { %v441_v26 = vsel %vm428_vm1, %v409_v24, -inf }
  0xfc   : > { %439 = vmax.xlane.f32.xlu1 %v438_v25  ;;  %442 = vmax.xlane.f32.xlu0 %v441_v26  ;;  %v1065_v27 = vpop.f32.mrf.mxu0 }
  0xfd   : > { %v450_v31 = vsel %vm428_vm1, %v1065_v27, -inf }
  0xfe   : > { %v419_v28 = vpop.f32.mrf.mxu0 }
  0xff   : > { %v447_v30 = vsel %vm428_vm1, %v419_v28, -inf }
 0x100   : > { %445 = vmax.xlane.f32.xlu1 %v444_v29  ;;  %448 = vmax.xlane.f32.xlu0 %v447_v30 }
 0x104   : > { %451 = vmax.xlane.f32.xlu1 %v450_v31 }
 0x17d   : > { %v431_v40 = vpop.xlane.xlu0 %430 }
 0x17e   : > { %v453_v41 = vsub.f32 %v389_v17, %v431_v40 }
 0x180   : > { %v461_v42 = vmul.f32 1.442695, %v453_v41 }
 0x181   : > { %v434_v43 = vpop.xlane.xlu0 %433  ;;  %v437_v44 = vpop.xlane.xlu1 %436 }
 0x182   : > { %920 = vpow2.f32 %v461_v42  ;;  %v454_v45 = vsub.f32 %v858_v16, %v434_v43  ;;  %v455_v46 = vsub.f32 %v399_v20, %v437_v44 }
 0x184   : > { %v463_v47 = vmul.f32 1.442695, %v454_v45  ;;  %v465_v48 = vmul.f32 1.442695, %v455_v46 }
 0x185   : > { %v440_v49 = vpop.xlane.xlu1 %439  ;;  %v443_v50 = vpop.xlane.xlu0 %442 }
 0x186   : > { %922 = vpow2.f32 %v463_v47  ;;  %v456_v51 = vsub.f32 %v861_v19, %v440_v49  ;;  %v457_v52 = vsub.f32 %v409_v24, %v443_v50 }
 0x187   : > { %924 = vpow2.f32 %v465_v48 }
 0x188   : > { %v467_v53 = vmul.f32 1.442695, %v456_v51  ;;  %v469_v54 = vmul.f32 1.442695, %v457_v52 }
 0x189   : > { %v446_v55 = vpop.xlane.xlu1 %445  ;;  %v449_v56 = vpop.xlane.xlu0 %448 }
 0x18a   : > { %926 = vpow2.f32 %v467_v53  ;;  %v458_v57 = vsub.f32 %v1061_v23, %v446_v55  ;;  %v459_v58 = vsub.f32 %v419_v28, %v449_v56 }
 0x18b   : > { %928 = vpow2.f32 %v469_v54 }
 0x18c   : > { %v471_v59 = vmul.f32 1.442695, %v458_v57  ;;  %v473_v60 = vmul.f32 1.442695, %v459_v58 }
 0x18d   : > { %v452_v61 = vpop.xlane.xlu1 %451 }
 0x18e   : > { %930 = vpow2.f32 %v471_v59  ;;  %v460_v62 = vsub.f32 %v1065_v27, %v452_v61 }
 0x18f   : > { %v921_v63 = vpop.eup %920  ;;  %932 = vpow2.f32 %v473_v60 }
 0x190   : > { %v475_v0 = vmul.f32 1.442695, %v460_v62  ;;  %884 = vmatprep.mubr.msk.f32.mxu1 %vm428_vm1, %v921_v63  ;;  %v477_v1 = vsel %vm428_vm1, %v921_v63, 0.0 }
 0x191   : > { %478 = vadd.xlane.f32.xlu0 %v477_v1 }
 0x192   : > { %934 = vpow2.f32 %v475_v0 }
 0x193   : > { %v923_v2 = vpop.eup %922 }
 0x194   : > { %v925_v3 = vpop.eup %924  ;;  %885 = vmatmul.mubr.msk.f32.vlgmr.msra.gmra.mxu1 %vm428_vm1, %v923_v2  ;;  %v480_v4 = vsel %vm428_vm1, %v923_v2, 0.0 }
 0x195   : > { %887 = vmatprep.mubr.msk.f32.mxu1 %vm428_vm1, %v925_v3  ;;  %481 = vadd.xlane.f32.xlu1 %v480_v4  ;;  %v483_v5 = vsel %vm428_vm1, %v925_v3, 0.0 }
 0x196   : > { %484 = vadd.xlane.f32.xlu0 %v483_v5 }
 0x197   : > { %v927_v6 = vpop.eup %926 }
 0x198   : > { %v929_v7 = vpop.eup %928  ;;  %888 = vmatmul.mubr.msk.f32.gmra.mxu1 %vm428_vm1, %v927_v6  ;;  %v486_v8 = vsel %vm428_vm1, %v927_v6, 0.0 }
 0x199   : > { %890 = vmatprep.mubr.msk.f32.mxu1 %vm428_vm1, %v929_v7  ;;  %487 = vadd.xlane.f32.xlu1 %v486_v8  ;;  %v489_v9 = vsel %vm428_vm1, %v929_v7, 0.0 }
 0x19a   : > { %490 = vadd.xlane.f32.xlu0 %v489_v9 }
 0x19b   : > { %v931_v10 = vpop.eup %930 }
 0x19c   : > { %v933_v11 = vpop.eup %932  ;;  %891 = vmatmul.mubr.msk.f32.gmra.mxu1 %vm428_vm1, %v931_v10  ;;  %v492_v12 = vsel %vm428_vm1, %v931_v10, 0.0 }
 0x19d   : > { %493 = vadd.xlane.f32.xlu1 %v492_v12  ;;  %893 = vmatprep.mubr.msk.f32.mxu1 %vm428_vm1, %v933_v11  ;;  %v495_v13 = vsel %vm428_vm1, %v933_v11, 0.0 }
 0x19e   : > { %496 = vadd.xlane.f32.xlu0 %v495_v13 }
 0x19f   : > { %v935_v14 = vpop.eup %934 }
 0x1a0   : > { %894 = vmatmul.mubr.msk.f32.gmra.mxu1 %vm428_vm1, %v935_v14  ;;  %v498_v15 = vsel %vm428_vm1, %v935_v14, 0.0 }
 0x1a1   : > { %499 = vadd.xlane.f32.xlu1 %v498_v15 }
 0x21a   : > { %v479_v17 = vpop.xlane.xlu0 %478 }
 0x21e   : > { %v482_v16 = vpop.xlane.xlu1 %481 }
 0x21f   : > { %v485_v19 = vpop.xlane.xlu0 %484  ;;  %936 = vrcp.f32 %v482_v16 }
 0x220   : > { %938 = vrcp.f32 %v479_v17 }
 0x222   : > { %v488_v18 = vpop.xlane.xlu1 %487 }
 0x223   : > { %940 = vrcp.f32 %v488_v18  ;;  %v491_v21 = vpop.xlane.xlu0 %490 }
 0x224   : > { %942 = vrcp.f32 %v485_v19 }
 0x226   : > { %v494_v20 = vpop.xlane.xlu1 %493 }
 0x227   : > { %944 = vrcp.f32 %v494_v20  ;;  %v497_v23 = vpop.xlane.xlu0 %496 }
 0x228   : > { %946 = vrcp.f32 %v491_v21 }
 0x22a   : > { %v500_v22 = vpop.xlane.xlu1 %499 }
 0x22b   : > { %948 = vrcp.f32 %v500_v22 }
 0x22c   : > { %v937_v24 = vpop.eup %936  ;;  %950 = vrcp.f32 %v497_v23 }
 0x22d   : > { %v939_v27 = vpop.eup %938 }
 0x230   : > { %v941_v30 = vpop.eup %940 }
 0x231   : > { %v943_v33 = vpop.eup %942 }
 0x234   : > { %v945_v36 = vpop.eup %944 }
 0x235   : > { %v947_v39 = vpop.eup %946 }
 0x238   : > { %v949_v42 = vpop.eup %948 }
 0x239   : > { %v951_v45 = vpop.eup %950 }
 0x254   : > { %v886_v25 = vpop.f32.mrf.mxu1 }
 0x255   : > { %v639_v26 = vmul.f32 %v937_v24, %v886_v25 }
 0x256   : > { %v591_v28 = vpop.f32.mrf.mxu1 }
 0x257   : > { %647 = vst.msk [vmem:[%s1098_s28 + $0x8] sm:$0xff] %vm274_vm0, %v639_v26  ;;  %v638_v29 = vmul.f32 %v939_v27, %v591_v28 }
 0x258   : > { %v889_v31 = vpop.f32.mrf.mxu1 }
 0x259   : > { %646 = vst.msk [vmem:[%s1098_s28] sm:$0xff] %vm274_vm0, %v638_v29  ;;  %v641_v32 = vmul.f32 %v941_v30, %v889_v31 }
 0x25a   : > { %v601_v34 = vpop.f32.mrf.mxu1 }
 0x25b   : > { %649 = vst.msk [vmem:[%s1098_s28 + $0x18] sm:$0xff] %vm274_vm0, %v641_v32  ;;  %v640_v35 = vmul.f32 %v943_v33, %v601_v34 }
 0x25c   : > { %v892_v37 = vpop.f32.mrf.mxu1 }
 0x25d   : > { %648 = vst.msk [vmem:[%s1098_s28 + $0x10] sm:$0xff] %vm274_vm0, %v640_v35  ;;  %v643_v38 = vmul.f32 %v945_v36, %v892_v37 }
 0x25e   : > { %v611_v40 = vpop.f32.mrf.mxu1 }
 0x25f   : > { %651 = vst.msk [vmem:[%s1098_s28 + $0x28] sm:$0xff] %vm274_vm0, %v643_v38  ;;  %v642_v41 = vmul.f32 %v947_v39, %v611_v40 }
 0x260   : > { %v895_v43 = vpop.f32.mrf.mxu1 }
 0x261   : > { %650 = vst.msk [vmem:[%s1098_s28 + $0x20] sm:$0xff] %vm274_vm0, %v642_v41  ;;  %v645_v44 = vmul.f32 %v949_v42, %v895_v43 }
 0x262   : > { %v621_v46 = vpop.f32.mrf.mxu1 }
 0x263   : > { %653 = vst.msk [vmem:[%s1098_s28 + $0x38] sm:$0xff] %vm274_vm0, %v645_v44  ;;  %v644_v47 = vmul.f32 %v951_v45, %v621_v46 }
 0x265   : > { %652 = vst.msk [vmem:[%s1098_s28 + $0x30] sm:$0xff] %vm274_vm0, %v644_v47 }
 0x266 PF: > { %s13_s14 = sadd.s32 1, %s974_s14   ;;  %s1129_s12 = smov %s970_s13 }
 0x267   : > { %p10_p5 = scmp.ge.s32.totalorder %s13_s14, 4   ;;  %s1130_s13 = smov %s1132_s15 }
 0x269   :  { %12 = sbr.rel (!%p10_p5) target bundleno = 2 (0x2), region = 68 }

</bundles_post_ra>
